<compile_context>
chip_gen: v6e
topology: v6e:2x2x1
jax: 0.10.0
libtpu: 0.0.40
codegen_flags: <defaults>
</compile_context>

<pallas_src>
import jax
import jax.numpy as jnp
from jax import lax
from jax.experimental import pallas as pl
from jax.experimental.pallas import tpu as pltpu

BN_EPS = 1e-5
NUM_CLASSES = 2
OUT_LANES = 128          # fc5 output padded to a full lane width


def _mlp_kernel(x_ref,
                w1_ref, b1_ref,
                w2_ref, b2_ref,
                w3_ref, b3_ref,
                w4_ref, b4_ref,
                w5_ref, b5_ref,
                o_ref):
    """Fused 5-layer MLP on one (TB, features) batch tile.

    BN1..3 are pre-folded into fc2..fc4; dropout is identity (eval mode).
    Dots use bf16 operands with f32 accumulation; bias/relu in f32.
    """
    h = jnp.dot(x_ref[...], w1_ref[...],
                preferred_element_type=jnp.float32) + b1_ref[...]
    h = jnp.maximum(h, 0.0)

    h = jnp.dot(h.astype(jnp.bfloat16), w2_ref[...],
                preferred_element_type=jnp.float32) + b2_ref[...]
    h = jnp.maximum(h, 0.0)

    h = jnp.dot(h.astype(jnp.bfloat16), w3_ref[...],
                preferred_element_type=jnp.float32) + b3_ref[...]
    h = jnp.maximum(h, 0.0)

    h = jnp.dot(h.astype(jnp.bfloat16), w4_ref[...],
                preferred_element_type=jnp.float32) + b4_ref[...]
    h = jnp.maximum(h, 0.0)

    out = jnp.dot(h.astype(jnp.bfloat16), w5_ref[...],
                  preferred_element_type=jnp.float32) + b5_ref[...]
    o_ref[...] = out.astype(o_ref.dtype)


def prepare_kernel_params(params):
    """Fold BN into the next Linear, pad fc5 to 128 lanes, cast weights to bf16."""
    (w1, b1, g1, be1, m1, v1,
     w2, b2, g2, be2, m2, v2,
     w3, b3, g3, be3, m3, v3,
     w4, b4, w5, b5) = params

    def fold(w_next, b_next, g, be, m, v):
        scale = g * lax.rsqrt(v + BN_EPS)        # (1, N_prev)
        shift = be - m * scale                   # (1, N_prev)
        w_f = scale.reshape(-1, 1) * w_next      # (N_prev, N_next)
        b_f = b_next + shift @ w_next            # (1, N_next)
        return w_f, b_f

    w2f, b2f = fold(w2, b2, g1, be1, m1, v1)
    w3f, b3f = fold(w3, b3, g2, be2, m2, v2)
    w4f, b4f = fold(w4, b4, g3, be3, m3, v3)

    # Lane-dense output: zero-pad fc5 to OUT_LANES output columns.
    w5p = jnp.zeros((w5.shape[0], OUT_LANES), jnp.float32).at[:, :NUM_CLASSES].set(w5)
    b5p = jnp.zeros((1, OUT_LANES), jnp.float32).at[:, :NUM_CLASSES].set(b5)

    bf16 = lambda w: w.astype(jnp.bfloat16)
    return [
        bf16(w1), b1,
        bf16(w2f), b2f,
        bf16(w3f), b3f,
        bf16(w4f), b4f,
        bf16(w5p), b5p,
    ]


def healthcare_forward(x, kernel_params, *, block_batch=512):
    """Batch-tiled, fully fused forward pass.

    VMEM budget per step (TB=512, double-buffered): x bf16 2*64KB, out f32
    2*256KB, weights ~120KB bf16 resident, activations <=512x256 f32 — safely
    inside the 32 MiB scoped default on every chip including v7x.
    """
    batch, feat = x.shape

    # Batch tile: multiple of 8, capped at block_batch.
    tb = min(block_batch, max(8, ((batch + 7) // 8) * 8))
    padded = pl.cdiv(batch, tb) * tb
    if padded != batch:
        x = jnp.pad(x, ((0, padded - batch), (0, 0)))
    x = x.astype(jnp.bfloat16)

    grid = (padded // tb,)
    x_spec = pl.BlockSpec((tb, feat), lambda i: (i, 0))
    out_spec = pl.BlockSpec((tb, OUT_LANES), lambda i: (i, 0))
    # Weights/biases: full-array blocks, constant index_map -> VMEM-resident.
    in_specs = [x_spec] + [pl.BlockSpec(p.shape, lambda i: (0, 0))
                           for p in kernel_params]

    out = pl.pallas_call(
        _mlp_kernel,
        out_shape=jax.ShapeDtypeStruct((padded, OUT_LANES), jnp.float32),
        grid=grid,
        in_specs=in_specs,
        out_specs=out_spec,
        compiler_params=pltpu.CompilerParams(
            dimension_semantics=("parallel",)),
    )(x, *kernel_params)

    return out[:batch, :NUM_CLASSES]


def init_params(key, input_features):
    """Deterministic params matching the PyTorch module's shapes.

    Linear weights stored [in, out]; biases / BN params are [1, dim].
    """
    dims = [input_features, 256, 128, 64, 32, 2]
    keys = jax.random.split(key, 32)
    ki = iter(range(32))

    def linear(fan_in, fan_out):
        bound = 1.0 / jnp.sqrt(fan_in)
        w = jax.random.uniform(keys[next(ki)], (fan_in, fan_out),
                               jnp.float32, -bound, bound)
        b = jax.random.uniform(keys[next(ki)], (1, fan_out),
                               jnp.float32, -bound, bound)
        return w, b

    def batchnorm(dim):
        gamma = jax.random.uniform(keys[next(ki)], (1, dim), jnp.float32, 0.8, 1.2)
        beta = jax.random.uniform(keys[next(ki)], (1, dim), jnp.float32, -0.1, 0.1)
        rmean = jax.random.uniform(keys[next(ki)], (1, dim), jnp.float32, -0.2, 0.2)
        rvar = jax.random.uniform(keys[next(ki)], (1, dim), jnp.float32, 0.5, 1.5)
        return gamma, beta, rmean, rvar

    w1, b1 = linear(dims[0], dims[1]); g1, be1, m1, v1 = batchnorm(dims[1])
    w2, b2 = linear(dims[1], dims[2]); g2, be2, m2, v2 = batchnorm(dims[2])
    w3, b3 = linear(dims[2], dims[3]); g3, be3, m3, v3 = batchnorm(dims[3])
    w4, b4 = linear(dims[3], dims[4])
    w5, b5 = linear(dims[4], dims[5])

    return [
        w1, b1, g1, be1, m1, v1,
        w2, b2, g2, be2, m2, v2,
        w3, b3, g3, be3, m3, v3,
        w4, b4,
        w5, b5,
    ]


def reference_forward(x, params):
    """Pure-JAX f32 reference with unfolded eval-mode BatchNorm."""
    (w1, b1, g1, be1, m1, v1,
     w2, b2, g2, be2, m2, v2,
     w3, b3, g3, be3, m3, v3,
     w4, b4, w5, b5) = params

    def bn(h, g, be, m, v):
        return g * (h - m) * lax.rsqrt(v + BN_EPS) + be

    h = jnp.maximum(x @ w1 + b1, 0.0); h = bn(h, g1, be1, m1, v1)
    h = jnp.maximum(h @ w2 + b2, 0.0); h = bn(h, g2, be2, m2, v2)
    h = jnp.maximum(h @ w3 + b3, 0.0); h = bn(h, g3, be3, m3, v3)
    h = jnp.maximum(h @ w4 + b4, 0.0)
    return h @ w5 + b5


if __name__ == "__main__":
    input_features = 64
    batch = 8

    key = jax.random.PRNGKey(0)
    k_x, k_p = jax.random.split(key)
    x = jax.random.normal(k_x, (batch, input_features), dtype=jnp.float32)
    params = init_params(k_p, input_features)
    kparams = prepare_kernel_params(params)

    out = healthcare_forward(x, kparams)
    out = jax.block_until_ready(out)

    ref = reference_forward(x, params)
    assert out.shape == (batch, NUM_CLASSES), out.shape
    # bf16 matmul operands (f32 accumulate) vs pure-f32 reference -> loosen tol.
    max_diff = jnp.max(jnp.abs(out - ref))
    assert jnp.allclose(out, ref, atol=5e-2, rtol=5e-2), (
        f"max abs diff = {max_diff}")

    print("KERNEL_OK")
</pallas_src>

<mosaic_0001>
module attributes {stable_mosaic.version = 11 : i64} {
  func.func @_mlp_kernel(%arg0: i32, %arg1: memref<8x64xbf16, #tpu.memory_space<vmem>>, %arg2: memref<64x256xbf16, #tpu.memory_space<vmem>>, %arg3: memref<1x256xf32, #tpu.memory_space<vmem>>, %arg4: memref<256x128xbf16, #tpu.memory_space<vmem>>, %arg5: memref<1x128xf32, #tpu.memory_space<vmem>>, %arg6: memref<128x64xbf16, #tpu.memory_space<vmem>>, %arg7: memref<1x64xf32, #tpu.memory_space<vmem>>, %arg8: memref<64x32xbf16, #tpu.memory_space<vmem>>, %arg9: memref<1x32xf32, #tpu.memory_space<vmem>>, %arg10: memref<32x128xbf16, #tpu.memory_space<vmem>>, %arg11: memref<1x128xf32, #tpu.memory_space<vmem>>, %arg12: memref<8x128xf32, #tpu.memory_space<vmem>>) attributes {dimension_semantics = [#tpu.dimension_semantics<parallel>], iteration_bounds = array<i64: 1>, scalar_prefetch = 0 : i64, scratch_operands = 0 : i64, tpu.core_type = #tpu.core_type<tc>, window_params = [{transform_indices = @transform_0, window_bounds = array<i64: 8, 64>}, {pipeline_mode = #tpu.pipeline_mode<synchronous>, transform_indices = @transform_1, window_bounds = array<i64: 64, 256>}, {pipeline_mode = #tpu.pipeline_mode<synchronous>, transform_indices = @transform_2, window_bounds = array<i64: 1, 256>}, {pipeline_mode = #tpu.pipeline_mode<synchronous>, transform_indices = @transform_3, window_bounds = array<i64: 256, 128>}, {pipeline_mode = #tpu.pipeline_mode<synchronous>, transform_indices = @transform_4, window_bounds = array<i64: 1, 128>}, {pipeline_mode = #tpu.pipeline_mode<synchronous>, transform_indices = @transform_5, window_bounds = array<i64: 128, 64>}, {pipeline_mode = #tpu.pipeline_mode<synchronous>, transform_indices = @transform_6, window_bounds = array<i64: 1, 64>}, {pipeline_mode = #tpu.pipeline_mode<synchronous>, transform_indices = @transform_7, window_bounds = array<i64: 64, 32>}, {pipeline_mode = #tpu.pipeline_mode<synchronous>, transform_indices = @transform_8, window_bounds = array<i64: 1, 32>}, {pipeline_mode = #tpu.pipeline_mode<synchronous>, transform_indices = @transform_9, window_bounds = array<i64: 32, 128>}, {pipeline_mode = #tpu.pipeline_mode<synchronous>, transform_indices = @transform_10, window_bounds = array<i64: 1, 128>}, {transform_indices = @transform_11, window_bounds = array<i64: 8, 128>}]} {
    %c0 = arith.constant 0 : index
    %c0_0 = arith.constant 0 : index
    %0 = vector.load %arg1[%c0, %c0_0] : memref<8x64xbf16, #tpu.memory_space<vmem>>, vector<8x64xbf16>
    %c0_1 = arith.constant 0 : index
    %c0_2 = arith.constant 0 : index
    %1 = vector.load %arg2[%c0_1, %c0_2] : memref<64x256xbf16, #tpu.memory_space<vmem>>, vector<64x256xbf16>
    %cst = arith.constant dense<0.000000e+00> : vector<8x256xf32>
    %2 = tpu.matmul %0, %1, %cst {dimension_numbers = #tpu.dot_dimension_numbers<[1], [0], [0], [1], [0, 0, 1, 1], [], []>} : vector<8x64xbf16>, vector<64x256xbf16>, vector<8x256xf32> -> vector<8x256xf32>
    %c0_3 = arith.constant 0 : index
    %c0_4 = arith.constant 0 : index
    %3 = vector.load %arg3[%c0_3, %c0_4] : memref<1x256xf32, #tpu.memory_space<vmem>>, vector<1x256xf32>
    %4 = vector.broadcast %3 : vector<1x256xf32> to vector<8x256xf32>
    %5 = arith.addf %2, %4 : vector<8x256xf32>
    %cst_5 = arith.constant 0.000000e+00 : f32
    %6 = vector.broadcast %cst_5 : f32 to vector<8x256xf32>
    %7 = arith.maximumf %5, %6 : vector<8x256xf32>
    %8 = arith.truncf %7 : vector<8x256xf32> to vector<8x256xbf16>
    %c0_6 = arith.constant 0 : index
    %c0_7 = arith.constant 0 : index
    %9 = vector.load %arg4[%c0_6, %c0_7] : memref<256x128xbf16, #tpu.memory_space<vmem>>, vector<256x128xbf16>
    %cst_8 = arith.constant dense<0.000000e+00> : vector<8x128xf32>
    %10 = tpu.matmul %8, %9, %cst_8 {dimension_numbers = #tpu.dot_dimension_numbers<[1], [0], [0], [1], [0, 0, 1, 1], [], []>} : vector<8x256xbf16>, vector<256x128xbf16>, vector<8x128xf32> -> vector<8x128xf32>
    %c0_9 = arith.constant 0 : index
    %c0_10 = arith.constant 0 : index
    %11 = vector.load %arg5[%c0_9, %c0_10] : memref<1x128xf32, #tpu.memory_space<vmem>>, vector<1x128xf32>
    %12 = vector.broadcast %11 : vector<1x128xf32> to vector<8x128xf32>
    %13 = arith.addf %10, %12 : vector<8x128xf32>
    %cst_11 = arith.constant 0.000000e+00 : f32
    %14 = vector.broadcast %cst_11 : f32 to vector<8x128xf32>
    %15 = arith.maximumf %13, %14 : vector<8x128xf32>
    %16 = arith.truncf %15 : vector<8x128xf32> to vector<8x128xbf16>
    %c0_12 = arith.constant 0 : index
    %c0_13 = arith.constant 0 : index
    %17 = vector.load %arg6[%c0_12, %c0_13] : memref<128x64xbf16, #tpu.memory_space<vmem>>, vector<128x64xbf16>
    %cst_14 = arith.constant dense<0.000000e+00> : vector<8x64xf32>
    %18 = tpu.matmul %16, %17, %cst_14 {dimension_numbers = #tpu.dot_dimension_numbers<[1], [0], [0], [1], [0, 0, 1, 1], [], []>} : vector<8x128xbf16>, vector<128x64xbf16>, vector<8x64xf32> -> vector<8x64xf32>
    %c0_15 = arith.constant 0 : index
    %c0_16 = arith.constant 0 : index
    %19 = vector.load %arg7[%c0_15, %c0_16] : memref<1x64xf32, #tpu.memory_space<vmem>>, vector<1x64xf32>
    %20 = vector.broadcast %19 : vector<1x64xf32> to vector<8x64xf32>
    %21 = arith.addf %18, %20 : vector<8x64xf32>
    %cst_17 = arith.constant 0.000000e+00 : f32
    %22 = vector.broadcast %cst_17 : f32 to vector<8x64xf32>
    %23 = arith.maximumf %21, %22 : vector<8x64xf32>
    %24 = arith.truncf %23 : vector<8x64xf32> to vector<8x64xbf16>
    %c0_18 = arith.constant 0 : index
    %c0_19 = arith.constant 0 : index
    %25 = vector.load %arg8[%c0_18, %c0_19] : memref<64x32xbf16, #tpu.memory_space<vmem>>, vector<64x32xbf16>
    %cst_20 = arith.constant dense<0.000000e+00> : vector<8x32xf32>
    %26 = tpu.matmul %24, %25, %cst_20 {dimension_numbers = #tpu.dot_dimension_numbers<[1], [0], [0], [1], [0, 0, 1, 1], [], []>} : vector<8x64xbf16>, vector<64x32xbf16>, vector<8x32xf32> -> vector<8x32xf32>
    %c0_21 = arith.constant 0 : index
    %c0_22 = arith.constant 0 : index
    %27 = vector.load %arg9[%c0_21, %c0_22] : memref<1x32xf32, #tpu.memory_space<vmem>>, vector<1x32xf32>
    %28 = vector.broadcast %27 : vector<1x32xf32> to vector<8x32xf32>
    %29 = arith.addf %26, %28 : vector<8x32xf32>
    %cst_23 = arith.constant 0.000000e+00 : f32
    %30 = vector.broadcast %cst_23 : f32 to vector<8x32xf32>
    %31 = arith.maximumf %29, %30 : vector<8x32xf32>
    %32 = arith.truncf %31 : vector<8x32xf32> to vector<8x32xbf16>
    %c0_24 = arith.constant 0 : index
    %c0_25 = arith.constant 0 : index
    %33 = vector.load %arg10[%c0_24, %c0_25] : memref<32x128xbf16, #tpu.memory_space<vmem>>, vector<32x128xbf16>
    %cst_26 = arith.constant dense<0.000000e+00> : vector<8x128xf32>
    %34 = tpu.matmul %32, %33, %cst_26 {dimension_numbers = #tpu.dot_dimension_numbers<[1], [0], [0], [1], [0, 0, 1, 1], [], []>} : vector<8x32xbf16>, vector<32x128xbf16>, vector<8x128xf32> -> vector<8x128xf32>
    %c0_27 = arith.constant 0 : index
    %c0_28 = arith.constant 0 : index
    %35 = vector.load %arg11[%c0_27, %c0_28] : memref<1x128xf32, #tpu.memory_space<vmem>>, vector<1x128xf32>
    %36 = vector.broadcast %35 : vector<1x128xf32> to vector<8x128xf32>
    %37 = arith.addf %34, %36 : vector<8x128xf32>
    %c0_29 = arith.constant 0 : index
    %c0_30 = arith.constant 0 : index
    %38 = vector.load %arg12[%c0_29, %c0_30] : memref<8x128xf32, #tpu.memory_space<vmem>>, vector<8x128xf32>
    tpu.vector_store %arg12[%c0_29, %c0_30], %37 {strides = array<i32>} : memref<8x128xf32, #tpu.memory_space<vmem>>, vector<8x128xf32>,
    return
  }
  func.func @transform_0(%arg0: i32) -> (i32, i32) {
    %c0_i32 = arith.constant 0 : i32
    %c0_i32_0 = arith.constant 0 : i32
    return %arg0, %c0_i32 : i32, i32
  }
  func.func @transform_1(%arg0: i32) -> (i32, i32) {
    %c0_i32 = arith.constant 0 : i32
    %c0_i32_0 = arith.constant 0 : i32
    %c0_i32_1 = arith.constant 0 : i32
    return %c0_i32, %c0_i32_0 : i32, i32
  }
  func.func @transform_2(%arg0: i32) -> (i32, i32) {
    %c0_i32 = arith.constant 0 : i32
    %c0_i32_0 = arith.constant 0 : i32
    %c0_i32_1 = arith.constant 0 : i32
    return %c0_i32, %c0_i32_0 : i32, i32
  }
  func.func @transform_3(%arg0: i32) -> (i32, i32) {
    %c0_i32 = arith.constant 0 : i32
    %c0_i32_0 = arith.constant 0 : i32
    %c0_i32_1 = arith.constant 0 : i32
    return %c0_i32, %c0_i32_0 : i32, i32
  }
  func.func @transform_4(%arg0: i32) -> (i32, i32) {
    %c0_i32 = arith.constant 0 : i32
    %c0_i32_0 = arith.constant 0 : i32
    %c0_i32_1 = arith.constant 0 : i32
    return %c0_i32, %c0_i32_0 : i32, i32
  }
  func.func @transform_5(%arg0: i32) -> (i32, i32) {
    %c0_i32 = arith.constant 0 : i32
    %c0_i32_0 = arith.constant 0 : i32
    %c0_i32_1 = arith.constant 0 : i32
    return %c0_i32, %c0_i32_0 : i32, i32
  }
  func.func @transform_6(%arg0: i32) -> (i32, i32) {
    %c0_i32 = arith.constant 0 : i32
    %c0_i32_0 = arith.constant 0 : i32
    %c0_i32_1 = arith.constant 0 : i32
    return %c0_i32, %c0_i32_0 : i32, i32
  }
  func.func @transform_7(%arg0: i32) -> (i32, i32) {
    %c0_i32 = arith.constant 0 : i32
    %c0_i32_0 = arith.constant 0 : i32
    %c0_i32_1 = arith.constant 0 : i32
    return %c0_i32, %c0_i32_0 : i32, i32
  }
  func.func @transform_8(%arg0: i32) -> (i32, i32) {
    %c0_i32 = arith.constant 0 : i32
    %c0_i32_0 = arith.constant 0 : i32
    %c0_i32_1 = arith.constant 0 : i32
    return %c0_i32, %c0_i32_0 : i32, i32
  }
  func.func @transform_9(%arg0: i32) -> (i32, i32) {
    %c0_i32 = arith.constant 0 : i32
    %c0_i32_0 = arith.constant 0 : i32
    %c0_i32_1 = arith.constant 0 : i32
    return %c0_i32, %c0_i32_0 : i32, i32
  }
  func.func @transform_10(%arg0: i32) -> (i32, i32) {
    %c0_i32 = arith.constant 0 : i32
    %c0_i32_0 = arith.constant 0 : i32
    %c0_i32_1 = arith.constant 0 : i32
    return %c0_i32, %c0_i32_0 : i32, i32
  }
  func.func @transform_11(%arg0: i32) -> (i32, i32) {
    %c0_i32 = arith.constant 0 : i32
    %c0_i32_0 = arith.constant 0 : i32
    return %arg0, %c0_i32 : i32, i32
  }
}

</mosaic_0001>

<bundles_post_ra>
// kernel: tpu_custom_call.1
= control target key start
LH: loop header
LB: loop body
LE: loop exit
PB: predicated region body
PF: predicated region fallthrough
CT: control target
= control target key end

     0   :  { %16 = vsyncpa [#allocation3], 0  ;;  %s1078_s0 = inlined_call_operand.vmem [shape: bf16[8,64], index: 0, kind: input, shape index: {}]   ;;  %s1079_s1 = inlined_call_operand.hbm [shape: bf16[64,256], index: 1, kind: input, shape index: {}]   ;;  %s1080_s2 = inlined_call_operand.hbm [shape: f32[1,256], index: 2, kind: input, shape index: {}]   ;;  %s1081_s3 = inlined_call_operand.vmem [shape: bf16[256,128], index: 3, kind: input, shape index: {}]   ;;  %s1082_s4 = inlined_call_operand.vmem [shape: f32[1,128], index: 4, kind: input, shape index: {}]   ;;  %s1083_s5 = inlined_call_operand.vmem [shape: bf16[128,64], index: 5, kind: input, shape index: {}]   ;;  %s1084_s6 = inlined_call_operand.vmem [shape: f32[1,64], index: 6, kind: input, shape index: {}]   ;;  %s1085_s7 = inlined_call_operand.vmem [shape: bf16[64,32], index: 7, kind: input, shape index: {}]   ;;  %s1086_s8 = inlined_call_operand.vmem [shape: f32[1,32], index: 8, kind: input, shape index: {}]   ;;  %s1087_s9 = inlined_call_operand.vmem [shape: bf16[32,128], index: 9, kind: input, shape index: {}]   ;;  %s1088_s10 = inlined_call_operand.vmem [shape: f32[1,128], index: 10, kind: input, shape index: {}]   ;;  %s1089_s11 = inlined_call_operand.hbm [shape: f32[8,128], index: 11, kind: output, shape index: {}]  }
   0x1   :  { %17 = vsyncpa [#allocation6], 0 }
   0x2   :  { %18 = vsyncpa [#allocation4], 0  ;;  %s874_s17 = smov [#allocation2]  }
   0x3   :  { %s26_s18 = sshll.u32 %s874_s17, 4  ;;  %s27_s18 = int_to_ptr.vmem [resolvable:$true] %s26_s18 }
   0x4   :  { %s816_s19 = scalar_lea.vmem %s27_s18, 1024  ;;  %p821_p1 = scmp.lt.s32.totalorder %s27_s18, %s27_s18 }
   0x5   :  { %p817_p0 = scmp.ne.s32.totalorder %s27_s18, %s816_s19  ;;  %p822_p2 = scmp.lt.s32.totalorder %s816_s19, %s816_s19 }
   0x7   :  { %p823_p3 = por %p822_p2, %p821_p1 }
   0x9   :  { %p824_p4 = pnand %p823_p3, %p817_p0 }
   0xb   :  { %827 = shalt.err (!%p824_p4)
}
   0xc   :  { %s875_s20 = smov 128   ;;  %s876_s21 = smov 8  }
   0xd   :  { %32 = dma.hbm_to_vmem [thread:$0]  %s1079_s1, 1024, %s27_s18, [#allocation3], %s875_s20, %s875_s20, %s876_s21  }
   0xe   :  { %s877_s24 = smov [#allocation5]  }
   0xf   :  { %s39_s25 = sshll.u32 %s877_s24, 4  ;;  %s40_s25 = int_to_ptr.vmem [resolvable:$true] %s39_s25 }
  0x10   :  { %s836_s26 = scalar_lea.vmem %s40_s25, 32  ;;  %p841_p6 = scmp.lt.s32.totalorder %s40_s25, %s40_s25 }
  0x11   :  { %p837_p5 = scmp.ne.s32.totalorder %s40_s25, %s836_s26  ;;  %p842_p7 = scmp.lt.s32.totalorder %s836_s26, %s836_s26 }
  0x13   :  { %p843_p8 = por %p842_p7, %p841_p6 }
  0x15   :  { %p844_p9 = pnand %p843_p8, %p837_p5 }
  0x17   :  { %847 = shalt.err (!%p844_p9)
}
  0x18   :  { %42 = dma.hbm_to_vmem [thread:$0]  %s1080_s2, 32, %s40_s25, [#allocation6]  }
  0x19   :  { %868 = dma.done.wait [#allocation3], 1024  }
  0x1a   :  { %869 = vsyncadd [#allocation3], 4294966272 }
  0x1b   :  { %870 = dma.done.wait [#allocation6], 32  }
  0x1c   :  { %871 = vsyncadd [#allocation6], 4294967264  ;;  %v878_v0 = vmov 0   ;;  %v766_v1 = vld [vmem:[#allocation2 + $0x34] ss:$8 sps:$4 sm:$0xff]   ;;  %v782_v12 = vld [vmem:[%s1081_s3 + $0x68] sm:$0xff]   ;;  %v77_v32 = vlaneseq }
  0x1d   :  { %163 = vmatprep.mubr.bf16.mxu0 %v878_v0  ;;  %v768_v2 = vld [vmem:[#allocation2 + $0x30] ss:$8 sps:$4 sm:$0xff]   ;;  %139 = vmatprep.subr.bf16.mxu0 %v766_v1  ;;  %v769_v3 = vld [vmem:[#allocation2 + $0x24] ss:$8 sps:$4 sm:$0xff]   ;;  %v771_v4 = vld [vmem:[#allocation2 + $0x20] ss:$8 sps:$4 sm:$0xff]  }
  0x1e   :  { %140 = vmatpush1.bf16.msra.mxu0 %v768_v2  ;;  %v772_v5 = vld [vmem:[#allocation2 + $0x14] ss:$8 sps:$4 sm:$0xff]   ;;  %v774_v6 = vld [vmem:[#allocation2 + $0x10] ss:$8 sps:$4 sm:$0xff]   ;;  %v775_v7 = vld [vmem:[#allocation2 + $0x4] ss:$8 sps:$4 sm:$0xff]  }
  0x1f   :  { %141 = vmatprep.subr.bf16.mxu0 %v769_v3  ;;  %v778_v8 = vld [vmem:[%s1081_s3 + $0x78] sm:$0xff]   ;;  %v780_v10 = vld [vmem:[%s1081_s3 + $0x70] sm:$0xff]   ;;  %v777_v13 = vld [vmem:[#allocation2] ss:$8 sps:$4 sm:$0xff]   ;;  %vm127_vm0 = vcmask 523264   ;;  %v879_v27 = vmov 0.0  }
  0x20   :  { %v779_v9 = vld [vmem:[%s1081_s3 + $0x38] sm:$0xff]   ;;  %679 = vmatprep.subr.bf16.mxu1 %v778_v8  ;;  %v781_v11 = vld [vmem:[%s1081_s3 + $0x30] sm:$0xff]   ;;  %v783_v14 = vld [vmem:[%s1081_s3 + $0x28] sm:$0xff]   ;;  %v78_v33 = vshrl.u32 %v77_v32, 7  ;;  %vm880_vm1 = vmmov 0   ;;  %vm573_vm2 = vcmask 261120  }
  0x21   :  { %680 = vmatpush3.bf16.msra.mxu1 %v779_v9  ;;  %v784_v15 = vld [vmem:[%s1081_s3 + $0x60] sm:$0xff]   ;;  %v786_v18 = vld [vmem:[%s1081_s3 + $0x58] sm:$0xff]   ;;  %v788_v20 = vld [vmem:[%s1081_s3 + $0x50] sm:$0xff]   ;;  %s881_s28 = smov [#allocation7]  }
  0x22   :  { %142 = vmatpush1.bf16.msra.mxu0 %v771_v4  ;;  %681 = vmatprep.subr.bf16.mxu1 %v780_v10  ;;  %v66_v16 = vld [vmem:[%s1078_s0] sm:$0xf]  ;;  %v787_v19 = vld [vmem:[%s1081_s3 + $0x18] sm:$0xff]   ;;  %v789_v21 = vld [vmem:[%s1081_s3 + $0x10] sm:$0xff]   ;;  %v79_v34 = vsub.s32 0, %v78_v33  ;;  %v83_v36 = vsub.s32 1, %v78_v33 }
  0x23   :  { %143 = vmatprep.subr.bf16.mxu0 %v772_v5  ;;  %v785_v17 = vld [vmem:[%s1081_s3 + $0x20] sm:$0xff]   ;;  %v790_v22 = vld [vmem:[%s1081_s3 + $0x48] sm:$0xff]   ;;  %v794_v26 = vld [vmem:[%s1083_s5 + $0x38] sm:$0xff]  }
  0x24   :  { %v791_v23 = vld [vmem:[%s1081_s3 + $0x8] sm:$0xff]   ;;  %v792_v24 = vld [vmem:[%s1081_s3 + $0x40] sm:$0xff]   ;;  %v795_v28 = vld [vmem:[%s1083_s5 + $0x30] sm:$0xff]  }
  0x25   :  { %682 = vmatpush3.bf16.msra.mxu1 %v781_v11  ;;  %v793_v25 = vld [vmem:[%s1081_s3] sm:$0xff]   ;;  %v796_v29 = vld [vmem:[%s1083_s5 + $0x28] sm:$0xff]   ;;  %v798_v31 = vld [vmem:[%s1083_s5 + $0x18] sm:$0xff]  }
  0x26   :  { %144 = vmatpush1.bf16.msra.mxu0 %v774_v6  ;;  %683 = vmatprep.subr.bf16.mxu1 %v782_v12  ;;  %v797_v30 = vld [vmem:[%s1083_s5 + $0x20] sm:$0xff]   ;;  %v799_v49 = vld [vmem:[%s1083_s5 + $0x10] sm:$0xff]   ;;  %v800_v50 = vld [vmem:[%s1083_s5 + $0x8] sm:$0xff]  }
  0x27   :  { %145 = vmatprep.subr.bf16.mxu0 %v775_v7  ;;  %v75_v35 = vld [vmem:[#allocation5] sm:$0x3]  ;;  %v802_v52 = vld [vmem:[%s1085_s7 + $0x18] sm:$0xff]   ;;  %v803_v53 = vld [vmem:[%s1085_s7 + $0x10] sm:$0xff]  }
  0x28   :  { %v80_v37 = vrot.slane %v75_v35, %v79_v34  ;;  %v84_v38 = vrot.slane %v75_v35, %v83_v36  ;;  %v801_v51 = vld [vmem:[%s1083_s5] sm:$0xff]   ;;  %v804_v63 = vld [vmem:[%s1085_s7 + $0x8] sm:$0xff]  }
  0x29   :  { %684 = vmatpush3.bf16.msra.mxu1 %v783_v14  ;;  %v643_v55 = vld [vmem:[%s1082_s4] ss:$0 sm:$0xff]  ;;  %v806_v1 = vld [vmem:[%s1087_s9 + $0x8] sm:$0xff]  }
  0x2a   :  { %146 = vmatpush1.bf16.msra.mxu0 %v777_v13  ;;  %685 = vmatprep.subr.bf16.mxu1 %v784_v15  ;;  %v805_v0 = vld [vmem:[%s1085_s7] sm:$0xff]  }
  0x2b   :  { %718 = vmatprep.subr.bf16.mxu0 %v879_v27  ;;  %v660_v2 = vld [vmem:[%s1084_s6] ss:$0 sm:$0xff] }
  0x2c   :  { %v807_v10 = vld [vmem:[%s1087_s9] sm:$0xff]   ;;  %s624_s9 = sshll.u32 %s881_s28, 4  ;;  %s625_s9 = int_to_ptr.vmem [resolvable:$true] %s624_s9 }
  0x2d   :  { %642 = vmatmul.mubr.msk.bf16.vlgmr.msra.gmra.mxu0 %vm127_vm0, %v66_v16  ;;  %686 = vmatpush3.bf16.msra.mxu1 %v785_v17  ;;  %v669_v11 = vld [vmem:[%s1086_s8] ss:$0 sm:$0xff]  ;;  %s848_s8 = scalar_lea.vmem %s625_s9, 128  ;;  %p853_p11 = scmp.lt.s32.totalorder %s625_s9, %s625_s9 }
  0x2e   :  { %687 = vmatprep.subr.bf16.mxu1 %v786_v18  ;;  %719 = vmatpush3.bf16.msra.mxu0 %v794_v26  ;;  %p849_p10 = scmp.ne.s32.totalorder %s625_s9, %s848_s8  ;;  %p854_p12 = scmp.lt.s32.totalorder %s848_s8, %s848_s8 }
  0x2f   :  { %720 = vmatprep.subr.bf16.mxu0 %v879_v27  ;;  %734 = vmatprep.mubr.msk.bf16.mxu0 %vm880_vm1, %v879_v27 }
  0x30   :  { %p855_p13 = por %p854_p12, %p853_p11 }
  0x31   :  { %688 = vmatpush3.bf16.msra.mxu1 %v787_v19  ;;  %v675_v19 = vld [vmem:[%s1088_s10] ss:$0 sm:$0xff] }
  0x32   :  { %689 = vmatprep.subr.bf16.mxu1 %v788_v20  ;;  %721 = vmatpush3.bf16.msra.mxu0 %v795_v28  ;;  %p856_p0 = pnand %p855_p13, %p849_p10 }
  0x33   :  { %722 = vmatprep.subr.bf16.mxu0 %v879_v27 }
  0x35   :  { %690 = vmatpush3.bf16.msra.mxu1 %v789_v21 }
  0x36   :  { %691 = vmatprep.subr.bf16.mxu1 %v790_v22  ;;  %723 = vmatpush3.bf16.msra.mxu0 %v796_v29 }
  0x37   :  { %724 = vmatprep.subr.bf16.mxu0 %v879_v27 }
  0x39   :  { %692 = vmatpush3.bf16.msra.mxu1 %v791_v23 }
  0x3a   :  { %693 = vmatprep.subr.bf16.mxu1 %v792_v24  ;;  %725 = vmatpush3.bf16.msra.mxu0 %v797_v30 }
  0x3b   :  { %726 = vmatprep.subr.bf16.mxu0 %v879_v27 }
  0x3d   :  { %694 = vmatpush3.bf16.msra.mxu1 %v793_v25 }
  0x3e   :  { %738 = vmatprep.subr.bf16.mxu1 %v879_v27  ;;  %727 = vmatpush3.bf16.msra.mxu0 %v798_v31 }
  0x3f   :  { %728 = vmatprep.subr.bf16.mxu0 %v879_v27 }
  0x42   :  { %729 = vmatpush3.bf16.msra.mxu0 %v799_v49 }
  0x43   :  { %730 = vmatprep.subr.bf16.mxu0 %v879_v27 }
  0x46   :  { %731 = vmatpush3.bf16.msra.mxu0 %v800_v50 }
  0x47   :  { %732 = vmatprep.subr.bf16.mxu0 %v879_v27 }
  0x4a   :  { %733 = vmatpush3.bf16.msra.mxu0 %v801_v51 }
  0x4b   :  { %750 = vmatprep.subr.bf16.mxu0 %v879_v27 }
  0xed   :  { %v165_v39 = vpop.f32.mrf.mxu0 }
  0xee   :  { %v166_v40 = vadd.f32 %v165_v39, %v80_v37 }
  0xef   :  { %v167_v41 = vpop.f32.mrf.mxu0 }
  0xf0   :  { %v168_v42 = vadd.f32 %v167_v41, %v84_v38  ;;  %v172_v43 = vmax.f32 %v166_v40, 0.0 }
  0xf1   :  { %v169_v44 = vpop.f32.mrf.mxu0 }
  0xf2   :  { %v173_v45 = vmax.f32 %v168_v42, 0.0  ;;  %v174_v48 = vpack.c.bf16 %v172_v43, %v172_v43 }
  0xf3   :  { %v170_v46 = vpop.f32.mrf.mxu0 }
  0xf4   :  { %v175_v47 = vpack.c.bf16 %v173_v45, %v173_v45 }
  0xf6   :  { %343 = vmatprep.mubr.bf16.mxu1 %v175_v47 }
  0xf7   :  { %344 = vmatmul.mubr.bf16.vlgmr.msra.gmra.mxu1 %v174_v48 }
  0xf8   :  { %746 = vmatprep.mubr.msk.bf16.mxu1 %vm880_vm1, %v879_v27  ;;  %739 = vmatpush3.bf16.msra.mxu1 %v802_v52 }
  0xf9   :  { %740 = vmatprep.subr.bf16.mxu1 %v879_v27 }
  0xfc   :  { %741 = vmatpush3.bf16.msra.mxu1 %v803_v53 }
  0xfd   :  { %742 = vmatprep.subr.bf16.mxu1 %v879_v27 }
 0x100   :  { %743 = vmatpush3.bf16.msra.mxu1 %v804_v63 }
 0x101   :  { %744 = vmatprep.subr.bf16.mxu1 %v879_v27 }
 0x104   :  { %745 = vmatpush3.bf16.msra.mxu1 %v805_v0 }
 0x1b7   :  { %v695_v54 = vpop.f32.mrf.mxu1 }
 0x1b9   :  { %v696_v56 = vpop.f32.mrf.mxu1 }
 0x1ba   :  { %v697_v57 = vadd.f32 %v696_v56, %v695_v54 }
 0x1bb   :  { %v698_v58 = vpop.f32.mrf.mxu1 }
 0x1bc   :  { %v346_v59 = vadd.f32 %v697_v57, %v643_v55 }
 0x1bd   :  { %v699_v60 = vpop.f32.mrf.mxu1 }
 0x1be   :  { %v351_v61 = vmax.f32 %v346_v59, 0.0 }
 0x1c0   :  { %v352_v62 = vpack.c.bf16 %v351_v61, %v351_v61 }
 0x1c2   :  { %735 = vmatmul.mubr.bf16.vlgmr.msra.gmra.mxu0 %v352_v62 }
 0x1c3   :  { %754 = vmatprep.mubr.msk.bf16.mxu0 %vm880_vm1, %v879_v27  ;;  %751 = vmatpush3.bf16.msra.mxu0 %v806_v1 }
 0x1c4   :  { %752 = vmatprep.subr.bf16.mxu0 %v879_v27 }
 0x1c7   :  { %753 = vmatpush3.bf16.msra.mxu0 %v807_v10 }
 0x282   :  { %v458_v3 = vpop.f32.mrf.mxu0 }
 0x283   :  { %v459_v4 = vadd.f32 %v660_v2, %v458_v3 }
 0x284   :  { %v736_v5 = vpop.f32.mrf.mxu0 }
 0x285   :  { %v464_v6 = vmax.f32 %v459_v4, 0.0 }
 0x286   :  { %v461_v7 = vpop.f32.mrf.mxu0 }
 0x287   :  { %v465_v8 = vpack.c.bf16 %v464_v6, %v464_v6 }
 0x288   :  { %v737_v9 = vpop.f32.mrf.mxu0 }
 0x289   :  { %747 = vmatmul.mubr.msk.bf16.vlgmr.msra.gmra.mxu1 %vm127_vm0, %v465_v8 }
 0x349   :  { %v542_v12 = vpop.f32.mrf.mxu1 }
 0x34a   :  { %v543_v13 = vadd.f32 %v669_v11, %v542_v12 }
 0x34b   :  { %v748_v14 = vpop.f32.mrf.mxu1 }
 0x34c   :  { %v548_v15 = vmax.f32 %v543_v13, 0.0 }
 0x34d   :  { %v545_v16 = vpop.f32.mrf.mxu1 }
 0x34e   :  { %v549_v17 = vpack.c.bf16 %v548_v15, %v548_v15 }
 0x34f   :  { %v749_v18 = vpop.f32.mrf.mxu1 }
 0x350   :  { %755 = vmatmul.mubr.msk.bf16.vlgmr.msra.gmra.mxu0 %vm573_vm2, %v549_v17 }
 0x410   :  { %v611_v20 = vpop.f32.mrf.mxu0 }
 0x411   :  { %v612_v21 = vadd.f32 %v675_v19, %v611_v20 }
 0x412   :  { %v756_v22 = vpop.f32.mrf.mxu0 }
 0x413   :  { %617 = vst [vmem:[#allocation7] sm:$0xff] %v612_v21 }
 0x414   :  { %v614_v23 = vpop.f32.mrf.mxu0 }
 0x415   :  { %859 = shalt.err (!%p856_p0)
}
 0x416   :  { %627 = dma.vmem_to_hbm [thread:$0]  %s625_s9, 128, %s1089_s11, [#allocation4]   ;;  %v757_v24 = vpop.f32.mrf.mxu0 }
 0x417   :  { %872 = dma.done.wait [#allocation4], 128  }
 0x418   :  { %873 = vsyncadd [#allocation4], 4294967168 }
 0x419   :  { %631 = vsyncpa [#allocation3], 1 }
 0x41a   :  { %632 = vsyncpa [#allocation6], 1 }
 0x41b   :  { %633 = vsyncpa [#allocation4], 1 }

</bundles_post_ra>
